<compile_context>
chip_gen: v7x
topology: tpu7x:2x2x1
jax: 0.10.0
libtpu: 0.0.40
codegen_flags: <defaults>
</compile_context>

<pallas_src>
import functools

import jax
import jax.numpy as jnp
from jax.experimental import pallas as pl
from jax.experimental.pallas import tpu as pltpu

OUT_RAW = 28 * 28          # 784 — full last dim of the output block (lane-dense enough:
                           # 6 unmasked vreg groups + 1 masked group of 16 lanes per row)


def _round_up(x, m):
    return (x + m - 1) // m * m


def _deep_decoder_kernel(x_ref, w0_ref, b0_ref, w1_ref, b1_ref, w2_ref, b2_ref, o_ref):
    x = x_ref[...]                       # (TB, F)
    tb = x.shape[0]
    w0 = w0_ref[...]                     # (F, H0)
    f_in, h0_dim = w0.shape

    # fc0 + ReLU on the VPU: unrolled K=F broadcast multiply-adds (static Python unroll).
    h0 = jnp.broadcast_to(b0_ref[...], (tb, h0_dim))
    for k in range(f_in):
        h0 = h0 + x[:, k:k + 1] * w0[k:k + 1, :]
    h0 = jnp.maximum(h0, 0.0)

    # fc1 + ReLU on the VPU: unrolled K=H0 broadcast multiply-adds.
    w1 = w1_ref[...]                     # (H0, H1)
    h1_dim = w1.shape[1]
    h1 = jnp.broadcast_to(b1_ref[...], (tb, h1_dim))
    for k in range(h0_dim):
        h1 = h1 + h0[:, k:k + 1] * w1[k:k + 1, :]
    h1 = jnp.maximum(h1, 0.0)

    # fc2 on the MXU (K=6, N=784) + sigmoid as a single EUP tanh per element.
    z = jnp.dot(h1, w2_ref[...], preferred_element_type=jnp.float32,
                precision=jax.lax.Precision.HIGHEST)
    z = z + b2_ref[...]
    y = 0.5 * jnp.tanh(0.5 * z) + 0.5    # == sigmoid(z), one transcendental per element
    o_ref[...] = y.astype(o_ref.dtype)


@functools.partial(jax.jit, static_argnames=("block_b", "out_dtype"))
def deep_decoder_forward(x, params, *, block_b=1024, out_dtype=jnp.float32):
    """x: (B, num_features) float32 -> (B, 1, 28, 28) in out_dtype."""
    w0, b0, w1, b1, w2, b2 = params
    B, F = x.shape
    H0 = w0.shape[1]
    H1 = w1.shape[1]

    # Batch tile: multiple of 8 sublanes, capped by block_b.  Guarantee >= 2 grid steps
    # when the batch is big enough so the "parallel" axis can shard across v7x's 2 TCs.
    b8 = _round_up(max(B, 8), 8)
    TB = min(_round_up(block_b, 8), b8)
    if b8 >= 16 and b8 // TB < 2:
        TB = _round_up(pl.cdiv(b8, 2), 8)
    Bp = _round_up(B, TB)
    if Bp != B:
        x = jnp.pad(x, ((0, Bp - B), (0, 0)))
    grid = (Bp // TB,)

    const = lambda i: (0, 0)   # weights / biases: same block every grid step (VMEM-resident)

    out_bytes = jnp.dtype(out_dtype).itemsize
    flops = 2 * Bp * (F * H0 + H0 * H1 + H1 * OUT_RAW)
    bytes_accessed = (4 * (Bp * F + F * H0 + H0 + H0 * H1 + H1 + H1 * OUT_RAW + OUT_RAW)
                      + out_bytes * Bp * OUT_RAW)
    cost = pl.CostEstimate(flops=flops,
                           transcendentals=Bp * OUT_RAW,
                           bytes_accessed=bytes_accessed)

    flat = pl.pallas_call(
        _deep_decoder_kernel,
        out_shape=jax.ShapeDtypeStruct((Bp, OUT_RAW), out_dtype),
        grid=grid,
        in_specs=[
            pl.BlockSpec((TB, F), lambda i: (i, 0)),      # x: tiled over batch
            pl.BlockSpec((F, H0), const),                 # w0
            pl.BlockSpec((1, H0), const),                 # b0
            pl.BlockSpec((H0, H1), const),                # w1
            pl.BlockSpec((1, H1), const),                 # b1
            pl.BlockSpec((H1, OUT_RAW), const),           # w2 (full dims -> legal block)
            pl.BlockSpec((1, OUT_RAW), const),            # b2
        ],
        out_specs=pl.BlockSpec((TB, OUT_RAW), lambda i: (i, 0)),
        compiler_params=pltpu.CompilerParams(
            dimension_semantics=("parallel",),            # v7x: shard batch tiles across TCs
            vmem_limit_bytes=48 * 1024 * 1024,            # TB<=2048 dbl-buffered, < v7x 64 MiB
        ),
        cost_estimate=cost,
    )(x, w0, b0, w1, b1, w2, b2)

    # Metadata-only reshape when the batch needed no padding; otherwise drop padded rows.
    if Bp != B:
        flat = flat[:B]
    return flat.reshape(-1, 1, 28, 28)


def init_params(key, num_features=2):
    """Synthetic init matching the PyTorch module's shapes.

    PyTorch Linear weight is (out, in); we store the transpose (in, out).
    Biases are stored as (1, out) for lane-major broadcasting in-kernel.
    """
    dims = [
        (num_features, num_features * 2),
        (num_features * 2, num_features * 3),
        (num_features * 3, OUT_RAW),
    ]
    params = []
    for fan_in, fan_out in dims:
        kw, kb, key = jax.random.split(key, 3)
        bound = 1.0 / (fan_in ** 0.5)
        w = jax.random.uniform(kw, (fan_in, fan_out), jnp.float32, -bound, bound)
        b = jax.random.uniform(kb, (1, fan_out), jnp.float32, -bound, bound)
        params += [w, b]
    return tuple(params)


def _reference(x, params):
    w0, b0, w1, b1, w2, b2 = params
    h = jnp.maximum(x @ w0 + b0, 0.0)
    h = jnp.maximum(h @ w1 + b1, 0.0)
    return jax.nn.sigmoid(h @ w2 + b2).reshape(-1, 1, 28, 28)


if __name__ == "__main__":
    key = jax.random.PRNGKey(0)
    k_x, k_x2, k_p = jax.random.split(key, 3)

    num_features = 2
    params = init_params(k_p, num_features=num_features)

    # Small case: single grid step (TB == 8), no batch padding, metadata-only reshape.
    batch = 8
    x = jax.random.normal(k_x, (batch, num_features), dtype=jnp.float32)
    out = jax.block_until_ready(deep_decoder_forward(x, params))
    assert out.shape == (batch, 1, 28, 28), out.shape
    assert out.dtype == jnp.float32
    ref = _reference(x, params)
    assert bool(jnp.allclose(out, ref, atol=1e-5, rtol=1e-5))

    # Larger case: exercises the >=2-grid-step megacore path (2 tiles of TB=152) + padding.
    batch2 = 300
    x2 = jax.random.normal(k_x2, (batch2, num_features), dtype=jnp.float32)
    out2 = jax.block_until_ready(deep_decoder_forward(x2, params))
    assert out2.shape == (batch2, 1, 28, 28), out2.shape
    ref2 = _reference(x2, params)
    assert bool(jnp.allclose(out2, ref2, atol=1e-5, rtol=1e-5))

    # bf16-output path (halves the dominant HBM write cost) — checked at a looser tolerance.
    out3 = jax.block_until_ready(
        deep_decoder_forward(x2, params, out_dtype=jnp.bfloat16))
    assert out3.dtype == jnp.bfloat16
    assert bool(jnp.allclose(out3.astype(jnp.float32), ref2, atol=1e-2, rtol=1e-2))

    print("KERNEL_OK")
</pallas_src>

<mosaic_0001>
module attributes {stable_mosaic.version = 11 : i64} {
  func.func @_deep_decoder_kernel(%arg0: i32, %arg1: memref<8x2xf32, #tpu.memory_space<vmem>>, %arg2: memref<2x4xf32, #tpu.memory_space<vmem>>, %arg3: memref<1x4xf32, #tpu.memory_space<vmem>>, %arg4: memref<4x6xf32, #tpu.memory_space<vmem>>, %arg5: memref<1x6xf32, #tpu.memory_space<vmem>>, %arg6: memref<6x784xf32, #tpu.memory_space<vmem>>, %arg7: memref<1x784xf32, #tpu.memory_space<vmem>>, %arg8: memref<8x784xf32, #tpu.memory_space<vmem>>) attributes {dimension_semantics = [#tpu.dimension_semantics<parallel>], iteration_bounds = array<i64: 1>, scalar_prefetch = 0 : i64, scratch_operands = 0 : i64, tpu.core_type = #tpu.core_type<tc>, window_params = [{transform_indices = @transform_0, window_bounds = array<i64: 8, 2>}, {pipeline_mode = #tpu.pipeline_mode<synchronous>, transform_indices = @transform_1, window_bounds = array<i64: 2, 4>}, {pipeline_mode = #tpu.pipeline_mode<synchronous>, transform_indices = @transform_2, window_bounds = array<i64: 1, 4>}, {pipeline_mode = #tpu.pipeline_mode<synchronous>, transform_indices = @transform_3, window_bounds = array<i64: 4, 6>}, {pipeline_mode = #tpu.pipeline_mode<synchronous>, transform_indices = @transform_4, window_bounds = array<i64: 1, 6>}, {pipeline_mode = #tpu.pipeline_mode<synchronous>, transform_indices = @transform_5, window_bounds = array<i64: 6, 784>}, {pipeline_mode = #tpu.pipeline_mode<synchronous>, transform_indices = @transform_6, window_bounds = array<i64: 1, 784>}, {transform_indices = @transform_7, window_bounds = array<i64: 8, 784>}]} {
    %c0 = arith.constant 0 : index
    %c0_0 = arith.constant 0 : index
    %0 = vector.load %arg1[%c0, %c0_0] : memref<8x2xf32, #tpu.memory_space<vmem>>, vector<8x2xf32>
    %c0_1 = arith.constant 0 : index
    %c0_2 = arith.constant 0 : index
    %1 = vector.load %arg2[%c0_1, %c0_2] : memref<2x4xf32, #tpu.memory_space<vmem>>, vector<2x4xf32>
    %c0_3 = arith.constant 0 : index
    %c0_4 = arith.constant 0 : index
    %2 = vector.load %arg3[%c0_3, %c0_4] : memref<1x4xf32, #tpu.memory_space<vmem>>, vector<1x4xf32>
    %3 = vector.shape_cast %2 : vector<1x4xf32> to vector<1x4xf32>
    %4 = vector.broadcast %3 : vector<1x4xf32> to vector<8x4xf32>
    %5 = vector.extract_strided_slice %0 {offsets = [0, 0], sizes = [8, 1], strides = [1, 1]} : vector<8x2xf32> to vector<8x1xf32>
    %6 = vector.extract_strided_slice %1 {offsets = [0, 0], sizes = [1, 4], strides = [1, 1]} : vector<2x4xf32> to vector<1x4xf32>
    %7 = vector.broadcast %5 : vector<8x1xf32> to vector<8x4xf32>
    %8 = vector.broadcast %6 : vector<1x4xf32> to vector<8x4xf32>
    %9 = arith.mulf %7, %8 : vector<8x4xf32>
    %10 = arith.addf %4, %9 : vector<8x4xf32>
    %11 = vector.extract_strided_slice %0 {offsets = [0, 1], sizes = [8, 1], strides = [1, 1]} : vector<8x2xf32> to vector<8x1xf32>
    %12 = vector.extract_strided_slice %1 {offsets = [1, 0], sizes = [1, 4], strides = [1, 1]} : vector<2x4xf32> to vector<1x4xf32>
    %13 = vector.broadcast %11 : vector<8x1xf32> to vector<8x4xf32>
    %14 = vector.broadcast %12 : vector<1x4xf32> to vector<8x4xf32>
    %15 = arith.mulf %13, %14 : vector<8x4xf32>
    %16 = arith.addf %10, %15 : vector<8x4xf32>
    %cst = arith.constant 0.000000e+00 : f32
    %17 = vector.broadcast %cst : f32 to vector<8x4xf32>
    %18 = arith.maximumf %16, %17 : vector<8x4xf32>
    %c0_5 = arith.constant 0 : index
    %c0_6 = arith.constant 0 : index
    %19 = vector.load %arg4[%c0_5, %c0_6] : memref<4x6xf32, #tpu.memory_space<vmem>>, vector<4x6xf32>
    %c0_7 = arith.constant 0 : index
    %c0_8 = arith.constant 0 : index
    %20 = vector.load %arg5[%c0_7, %c0_8] : memref<1x6xf32, #tpu.memory_space<vmem>>, vector<1x6xf32>
    %21 = vector.shape_cast %20 : vector<1x6xf32> to vector<1x6xf32>
    %22 = vector.broadcast %21 : vector<1x6xf32> to vector<8x6xf32>
    %23 = vector.extract_strided_slice %18 {offsets = [0, 0], sizes = [8, 1], strides = [1, 1]} : vector<8x4xf32> to vector<8x1xf32>
    %24 = vector.extract_strided_slice %19 {offsets = [0, 0], sizes = [1, 6], strides = [1, 1]} : vector<4x6xf32> to vector<1x6xf32>
    %25 = vector.broadcast %23 : vector<8x1xf32> to vector<8x6xf32>
    %26 = vector.broadcast %24 : vector<1x6xf32> to vector<8x6xf32>
    %27 = arith.mulf %25, %26 : vector<8x6xf32>
    %28 = arith.addf %22, %27 : vector<8x6xf32>
    %29 = vector.extract_strided_slice %18 {offsets = [0, 1], sizes = [8, 1], strides = [1, 1]} : vector<8x4xf32> to vector<8x1xf32>
    %30 = vector.extract_strided_slice %19 {offsets = [1, 0], sizes = [1, 6], strides = [1, 1]} : vector<4x6xf32> to vector<1x6xf32>
    %31 = vector.broadcast %29 : vector<8x1xf32> to vector<8x6xf32>
    %32 = vector.broadcast %30 : vector<1x6xf32> to vector<8x6xf32>
    %33 = arith.mulf %31, %32 : vector<8x6xf32>
    %34 = arith.addf %28, %33 : vector<8x6xf32>
    %35 = vector.extract_strided_slice %18 {offsets = [0, 2], sizes = [8, 1], strides = [1, 1]} : vector<8x4xf32> to vector<8x1xf32>
    %36 = vector.extract_strided_slice %19 {offsets = [2, 0], sizes = [1, 6], strides = [1, 1]} : vector<4x6xf32> to vector<1x6xf32>
    %37 = vector.broadcast %35 : vector<8x1xf32> to vector<8x6xf32>
    %38 = vector.broadcast %36 : vector<1x6xf32> to vector<8x6xf32>
    %39 = arith.mulf %37, %38 : vector<8x6xf32>
    %40 = arith.addf %34, %39 : vector<8x6xf32>
    %41 = vector.extract_strided_slice %18 {offsets = [0, 3], sizes = [8, 1], strides = [1, 1]} : vector<8x4xf32> to vector<8x1xf32>
    %42 = vector.extract_strided_slice %19 {offsets = [3, 0], sizes = [1, 6], strides = [1, 1]} : vector<4x6xf32> to vector<1x6xf32>
    %43 = vector.broadcast %41 : vector<8x1xf32> to vector<8x6xf32>
    %44 = vector.broadcast %42 : vector<1x6xf32> to vector<8x6xf32>
    %45 = arith.mulf %43, %44 : vector<8x6xf32>
    %46 = arith.addf %40, %45 : vector<8x6xf32>
    %cst_9 = arith.constant 0.000000e+00 : f32
    %47 = vector.broadcast %cst_9 : f32 to vector<8x6xf32>
    %48 = arith.maximumf %46, %47 : vector<8x6xf32>
    %c0_10 = arith.constant 0 : index
    %c0_11 = arith.constant 0 : index
    %49 = vector.load %arg6[%c0_10, %c0_11] : memref<6x784xf32, #tpu.memory_space<vmem>>, vector<6x784xf32>
    %cst_12 = arith.constant dense<0.000000e+00> : vector<8x784xf32>
    %50 = tpu.matmul %48, %49, %cst_12 {dimension_numbers = #tpu.dot_dimension_numbers<[1], [0], [0], [1], [0, 0, 1, 1], [], []>, precision = #tpu.contract_precision<fp32>} : vector<8x6xf32>, vector<6x784xf32>, vector<8x784xf32> -> vector<8x784xf32>
    %c0_13 = arith.constant 0 : index
    %c0_14 = arith.constant 0 : index
    %51 = vector.load %arg7[%c0_13, %c0_14] : memref<1x784xf32, #tpu.memory_space<vmem>>, vector<1x784xf32>
    %52 = vector.broadcast %51 : vector<1x784xf32> to vector<8x784xf32>
    %53 = arith.addf %50, %52 : vector<8x784xf32>
    %cst_15 = arith.constant 5.000000e-01 : f32
    %54 = vector.broadcast %cst_15 : f32 to vector<8x784xf32>
    %55 = arith.mulf %54, %53 : vector<8x784xf32>
    %56 = math.tanh %55 : vector<8x784xf32>
    %cst_16 = arith.constant 5.000000e-01 : f32
    %57 = vector.broadcast %cst_16 : f32 to vector<8x784xf32>
    %58 = arith.mulf %57, %56 : vector<8x784xf32>
    %cst_17 = arith.constant 5.000000e-01 : f32
    %59 = vector.broadcast %cst_17 : f32 to vector<8x784xf32>
    %60 = arith.addf %58, %59 : vector<8x784xf32>
    %c0_18 = arith.constant 0 : index
    %c0_19 = arith.constant 0 : index
    %61 = vector.load %arg8[%c0_18, %c0_19] : memref<8x784xf32, #tpu.memory_space<vmem>>, vector<8x784xf32>
    tpu.vector_store %arg8[%c0_18, %c0_19], %60 {strides = array<i32>} : memref<8x784xf32, #tpu.memory_space<vmem>>, vector<8x784xf32>,
    return
  }
  func.func @transform_0(%arg0: i32) -> (i32, i32) {
    %c0_i32 = arith.constant 0 : i32
    %c0_i32_0 = arith.constant 0 : i32
    return %arg0, %c0_i32 : i32, i32
  }
  func.func @transform_1(%arg0: i32) -> (i32, i32) {
    %c0_i32 = arith.constant 0 : i32
    %c0_i32_0 = arith.constant 0 : i32
    %c0_i32_1 = arith.constant 0 : i32
    return %c0_i32, %c0_i32_0 : i32, i32
  }
  func.func @transform_2(%arg0: i32) -> (i32, i32) {
    %c0_i32 = arith.constant 0 : i32
    %c0_i32_0 = arith.constant 0 : i32
    %c0_i32_1 = arith.constant 0 : i32
    return %c0_i32, %c0_i32_0 : i32, i32
  }
  func.func @transform_3(%arg0: i32) -> (i32, i32) {
    %c0_i32 = arith.constant 0 : i32
    %c0_i32_0 = arith.constant 0 : i32
    %c0_i32_1 = arith.constant 0 : i32
    return %c0_i32, %c0_i32_0 : i32, i32
  }
  func.func @transform_4(%arg0: i32) -> (i32, i32) {
    %c0_i32 = arith.constant 0 : i32
    %c0_i32_0 = arith.constant 0 : i32
    %c0_i32_1 = arith.constant 0 : i32
    return %c0_i32, %c0_i32_0 : i32, i32
  }
  func.func @transform_5(%arg0: i32) -> (i32, i32) {
    %c0_i32 = arith.constant 0 : i32
    %c0_i32_0 = arith.constant 0 : i32
    %c0_i32_1 = arith.constant 0 : i32
    return %c0_i32, %c0_i32_0 : i32, i32
  }
  func.func @transform_6(%arg0: i32) -> (i32, i32) {
    %c0_i32 = arith.constant 0 : i32
    %c0_i32_0 = arith.constant 0 : i32
    %c0_i32_1 = arith.constant 0 : i32
    return %c0_i32, %c0_i32_0 : i32, i32
  }
  func.func @transform_7(%arg0: i32) -> (i32, i32) {
    %c0_i32 = arith.constant 0 : i32
    %c0_i32_0 = arith.constant 0 : i32
    return %arg0, %c0_i32 : i32, i32
  }
}

</mosaic_0001>

<bundles_post_ra>
// kernel: deep_decoder_forward.1
= control target key start
LH: loop header
LB: loop body
LE: loop exit
PB: predicated region body
PF: predicated region fallthrough
CT: control target
= control target key end

     0   :  { %12 = vsyncpa [#allocation3], 0  ;;  %s2213_s24 = smov [#allocation2]   ;;  %s2477_s0 = inlined_call_operand.vmem [shape: f32[8,2], index: 0, kind: input, shape index: {}]   ;;  %s2478_s1 = inlined_call_operand.vmem [shape: f32[2,4], index: 1, kind: input, shape index: {}]   ;;  %s2479_s2 = inlined_call_operand.vmem [shape: f32[1,4], index: 2, kind: input, shape index: {}]   ;;  %s2480_s3 = inlined_call_operand.vmem [shape: f32[4,6], index: 3, kind: input, shape index: {}]   ;;  %s2481_s4 = inlined_call_operand.vmem [shape: f32[1,6], index: 4, kind: input, shape index: {}]   ;;  %s2482_s5 = inlined_call_operand.hbm [shape: f32[6,784], index: 5, kind: input, shape index: {}]   ;;  %s2483_s6 = inlined_call_operand.vmem [shape: f32[1,784], index: 6, kind: input, shape index: {}]   ;;  %s2484_s7 = inlined_call_operand.vmem [shape: f32[8,784], index: 7, kind: output, shape index: {}]  }
   0x1   :  { %s29_s25 = sshll.u32 %s2213_s24, 4  ;;  %s2189_s28 = scalar_lea.hbm %s2482_s5, 896  ;;  %s30_s25 = int_to_ptr.vmem [resolvable:$true] %s29_s25 }
   0x2   :  { %p2190_p0 = scmp.ne.s32.totalorder %s2482_s5, %s2189_s28  ;;  %p2193_p1 = scmp.lt.u32.totalorder %s2189_s28, %s2482_s5 }
   0x4   :  { %p2195_p2 = pnand %p2193_p1, %p2190_p0 }
   0x6   :  { %2198 = shalt.err (!%p2195_p2)
}
   0x7   :  { %s2199_s10 = scalar_lea.vmem %s30_s25, 896  ;;  %p2204_p4 = scmp.lt.s32.totalorder %s30_s25, %s30_s25 }
   0x8   :  { %p2200_p3 = scmp.ne.s32.totalorder %s30_s25, %s2199_s10  ;;  %p2205_p5 = scmp.lt.s32.totalorder %s2199_s10, %s2199_s10 }
   0xa   :  { %p2206_p6 = por %p2205_p5, %p2204_p4 }
   0xc   :  { %p2207_p7 = pnand %p2206_p6, %p2200_p3 }
   0xe   :  { %2210 = shalt.err (!%p2207_p7)
}
   0xf   :  { %32 = dma.hbm_to_vmem [thread:$0]  %s2482_s5, 896, %s30_s25, [#allocation3]  }
  0x10   :  { %2211 = dma.done.wait [#allocation3], 896  }
  0x11   :  { %2212 = vsyncadd [#allocation3], 4294966400  ;;  %v2214_v0 = vmov 0   ;;  %v38_v1 = vld [vmem:[%s2477_s0] sm:$0xff]  ;;  %v2215_v2 = vmov 1   ;;  %v2216_v3 = vmov 3   ;;  %v52_v4 = vlaneseq }
  0x12   :  { %2169 = vset.pattern.permute.xlu0 %v2214_v0  ;;  %2171 = vset.pattern.permute.xlu1 %v2214_v0  ;;  %v39_v7 = vld [vmem:[%s2478_s1] sm:$0x3]  ;;  %v2217_v19 = vmov 2   ;;  %v120_v20 = vld [vmem:[#allocation2 + $0x8] sm:$0x3f]  ;;  %vm167_vm0 = vcmask 1045504  }
  0x13   :  { %49 = vperm.xlu0 %2169, %v38_v1   ;;  %v2275_v5 = vshrl.u32 %v52_v4, 7  ;;  %v2071_v13 = vld [vmem:[%s2479_s2] ss:$0 sm:$0xff]  ;;  %v119_v21 = vld [vmem:[#allocation2] sm:$0x3f]  ;;  %v172_v22 = vsel %vm167_vm0, %v120_v20, 0 }
  0x14   :  { %v169_v23 = vsel %vm167_vm0, %v119_v21, 0  ;;  %v122_v24 = vld [vmem:[#allocation2 + $0x18] sm:$0x3f]  ;;  %v2218_v25 = vmov 0.0   ;;  %v121_v26 = vld [vmem:[#allocation2 + $0x10] sm:$0x3f] }
  0x15   :  { %v2278_v6 = vsub.s32 0, %v2275_v5  ;;  %v2285_v9 = vsub.s32 1, %v2275_v5  ;;  %255 = vmatprep.mubr.f32.mxu0 %v2218_v25  ;;  %720 = vmatprep.mubr.f32.mxu1 %v2218_v25  ;;  %v2295_v27 = vand.u32 4294901760, %v172_v22  ;;  %v2297_v28 = vand.u32 4294901760, %v169_v23  ;;  %v69_v41 = vld [vmem:[%s2480_s3] sm:$0xf] }
  0x16   :  { %v178_v29 = vsel %vm167_vm0, %v122_v24, 0  ;;  %v175_v30 = vsel %vm167_vm0, %v121_v26, 0  ;;  %v104_v45 = vsub.s32 2, %v2275_v5  ;;  %v114_v46 = vsub.s32 3, %v2275_v5  ;;  %v2072_v49 = vld [vmem:[%s2481_s4] ss:$0 sm:$0xff] }
  0x17   :  { %2170 = vset.pattern.permute.xlu0 %v2215_v2  ;;  %v55_v8 = vrot.slane %v39_v7, %v2278_v6  ;;  %v65_v12 = vrot.slane %v39_v7, %v2285_v9  ;;  %v2301_v31 = vand.u32 4294901760, %v178_v29  ;;  %v2303_v32 = vand.u32 4294901760, %v175_v30  ;;  %190 = vmatprep.subr.mxu0 %v2295_v27 }
  0x18   :  { %59 = vperm.xlu0 %2170, %v38_v1   ;;  %v2307_v33 = vsub.f32 %v172_v22, %v2295_v27  ;;  %192 = vmatpush1.msra.mxu0 %v2297_v28  ;;  %v85_v43 = vrot.slane %v69_v41, %v2278_v6  ;;  %v95_v44 = vrot.slane %v69_v41, %v2285_v9  ;;  %vm163_vm1 = vcmask 48128  }
  0x19   :  { %655 = vmatprep.subr.mxu1 %v2301_v31  ;;  %v2314_v35 = vsub.f32 %v178_v29, %v2301_v31  ;;  %v105_v51 = vrot.slane %v69_v41, %v104_v45  ;;  %v115_v52 = vrot.slane %v69_v41, %v114_v46  ;;  %v274_v61 = vsub.f32 %v169_v23, %v2297_v28 }
  0x1a   :  { %v269_v34 = vand.u32 4294901760, %v2307_v33  ;;  %657 = vmatpush1.msra.mxu1 %v2303_v32  ;;  %v739_v62 = vsub.f32 %v175_v30, %v2303_v32  ;;  %vm2219_vm2 = vmmov 0   ;;  %vm2064_vm3 = vcmask 130048  }
  0x1b   :  { %v734_v37 = vand.u32 4294901760, %v2314_v35  ;;  %v275_v1 = vand.u32 4294901760, %v274_v61 }
  0x1c   :  { %2174 = vset.pattern.permute.xlu0 %v2216_v3  ;;  %v270_v36 = vsub.f32 %v2307_v33, %v269_v34 }
  0x1d   :  { %v735_v39 = vsub.f32 %v2314_v35, %v734_v37  ;;  %v276_v7 = vsub.f32 %v274_v61, %v275_v1 }
  0x1e   :  { %v271_v38 = vand.u32 4294901760, %v270_v36 }
  0x1f   :  { %v736_v40 = vand.u32 4294901760, %v735_v39 }
  0x20   :  { %272 = vmatprep.subr.mxu0 %v271_v38 }
  0x21   :  { %737 = vmatprep.subr.mxu1 %v736_v40 }
  0x92   :  { %v50_v10 = vpop.permute.xlu0 %49 }
  0x93   :  { %v56_v11 = vmul.f32 %v55_v8, %v50_v10 }
  0x95   :  { %v57_v15 = vadd.f32 %v2071_v13, %v56_v11 }
  0x97   :  { %v60_v14 = vpop.permute.xlu0 %59 }
  0x98   :  { %v66_v16 = vmul.f32 %v65_v12, %v60_v14  ;;  %v277_v12 = vand.u32 4294901760, %v276_v7 }
  0x9a   :  { %v67_v17 = vadd.f32 %v66_v16, %v57_v15  ;;  %v124_v15 = vld [vmem:[#allocation2 + $0x28] sm:$0x3f] }
  0x9b   :  { %v184_v16 = vsel %vm167_vm0, %v124_v15, 0 }
  0x9c   :  { %v68_v18 = vmax.f32 %v67_v17, 0.0  ;;  %v123_v17 = vld [vmem:[#allocation2 + $0x20] sm:$0x3f] }
  0x9d   :  { %v181_v20 = vsel %vm167_vm0, %v123_v17, 0 }
  0x9e   :  { %109 = vperm.xlu0 %2174, %v68_v18   ;;  %79 = vperm.xlu1 %2171, %v68_v18   ;;  %v2380_v22 = vand.u32 4294901760, %v181_v20 }
  0xa0   :  { %v1204_v26 = vsub.f32 %v181_v20, %v2380_v22 }
  0xa2   :  { %2172 = vset.pattern.permute.xlu1 %v2215_v2  ;;  %v740_v2 = vand.u32 4294901760, %v739_v62 }
  0xa3   :  { %89 = vperm.xlu1 %2172, %v68_v18  }
  0xa4   :  { %v741_v8 = vsub.f32 %v739_v62, %v740_v2 }
  0xa6   :  { %v742_v13 = vand.u32 4294901760, %v741_v8 }
  0xa7   :  { %2173 = vset.pattern.permute.xlu1 %v2217_v19  ;;  %v2374_v19 = vand.u32 4294901760, %v184_v16 }
  0xa8   :  { %99 = vperm.xlu1 %2173, %v68_v18   ;;  %v125_v18 = vld [vmem:[#allocation2 + $0x30] sm:$0x3f] }
  0xa9   :  { %v187_v21 = vsel %vm167_vm0, %v125_v18, 0  ;;  %v1198_v24 = vsub.f32 %v184_v16, %v2374_v19 }
  0xaa   :  { %v2382_v23 = vand.u32 4294901760, %v187_v21 }
  0xab   :  { %v1199_v30 = vand.u32 4294901760, %v1198_v24 }
  0xac   :  { %v1662_v29 = vsub.f32 %v187_v21, %v2382_v23 }
 0x11d   :  { %v80_v42 = vpop.permute.xlu1 %79  ;;  %v110_v54 = vpop.permute.xlu0 %109 }
 0x11e   :  { %v86_v47 = vmul.f32 %v85_v43, %v80_v42  ;;  %v116_v58 = vmul.f32 %v115_v52, %v110_v54 }
 0x120   :  { %v87_v53 = vadd.f32 %v2072_v49, %v86_v47 }
 0x122   :  { %v90_v48 = vpop.permute.xlu1 %89 }
 0x123   :  { %v96_v50 = vmul.f32 %v95_v44, %v90_v48 }
 0x125   :  { %v97_v56 = vadd.f32 %v96_v50, %v87_v53 }
 0x127   :  { %v100_v55 = vpop.permute.xlu1 %99 }
 0x128   :  { %v106_v57 = vmul.f32 %v105_v51, %v100_v55 }
 0x12a   :  { %v107_v59 = vadd.f32 %v106_v57, %v97_v56 }
 0x12c   :  { %v117_v60 = vadd.f32 %v116_v58, %v107_v59 }
 0x12e   :  { %v118_v63 = vmax.f32 %v117_v60, 0.0 }
 0x130   :  { %v165_v0 = vsel %vm163_vm1, %v118_v63, 0  ;;  %v146_v63 = vsub.s32 4, %v2275_v5 }
 0x131   :  { %v2339_v3 = vand.u32 4294901760, %v165_v0 }
 0x133   :  { %v2342_v4 = vsub.f32 %v165_v0, %v2339_v3  ;;  %v154_v0 = vsub.s32 6, %v2275_v5 }
 0x135   :  { %v2345_v10 = vand.u32 4294901760, %v2342_v4 }
 0x137   :  { %v259_v11 = vsub.f32 %v2342_v4, %v2345_v10 }
 0x139   :  { %v2349_v14 = vand.u32 4294901760, %v259_v11 }
 0x13b   :  { %261 = vmatmul.mubr.f32.vlgmr.msra.gmra.mrb[0].mxu0 %v2349_v14  ;;  %726 = vmatmul.mubr.f32.vlgmr.msra.gmra.mrb[0].mxu1 %v2349_v14 }
 0x13c   :  { %278 = vmatpush1.msra.mxu0 %v277_v12  ;;  %743 = vmatpush1.msra.mxu1 %v742_v13 }
 0x13d   :  { %341 = vmatprep.mubr.f32.mxu0 %v2218_v25  ;;  %351 = vmatprep.subr.mxu0 %v2307_v33  ;;  %v1663_v33 = vand.u32 4294901760, %v1662_v29 }
 0x13e   :  { %806 = vmatprep.mubr.f32.mxu1 %v2218_v25  ;;  %816 = vmatprep.subr.mxu1 %v2314_v35 }
 0x13f   :  { %v1664_v35 = vsub.f32 %v1662_v29, %v1663_v33 }
 0x143   :  { %343 = vmatmul.mubr.f32.vlgmr.msra.gmra.mrb[0].mxu0 %v2339_v3  ;;  %808 = vmatmul.mubr.f32.vlgmr.msra.gmra.mrb[0].mxu1 %v2339_v3 }
 0x144   :  { %354 = vmatpush1.msra.mxu0 %v274_v61  ;;  %819 = vmatpush1.msra.mxu1 %v739_v62 }
 0x145   :  { %417 = vmatprep.mubr.f32.mxu0 %v2218_v25  ;;  %427 = vmatprep.subr.mxu0 %v2295_v27 }
 0x146   :  { %882 = vmatprep.mubr.f32.mxu1 %v2218_v25  ;;  %892 = vmatprep.subr.mxu1 %v2301_v31 }
 0x14b   :  { %420 = vmatmul.mubr.f32.vlgmr.msra.gmra.mrb[0].mxu0 %v2342_v4  ;;  %885 = vmatmul.mubr.f32.vlgmr.msra.gmra.mrb[0].mxu1 %v2342_v4 }
 0x14c   :  { %429 = vmatpush1.msra.mxu0 %v2297_v28  ;;  %894 = vmatpush1.msra.mxu1 %v2303_v32 }
 0x14d   :  { %492 = vmatprep.mubr.f32.mxu0 %v2218_v25  ;;  %505 = vmatprep.subr.mxu0 %v269_v34 }
 0x14e   :  { %957 = vmatprep.mubr.f32.mxu1 %v2218_v25  ;;  %970 = vmatprep.subr.mxu1 %v734_v37  ;;  %v126_v37 = vld [vmem:[%s2483_s6] sm:$0x7f] }
 0x14f   :  { %v131_v38 = vrot.slane %v126_v37, %v2278_v6  ;;  %v139_v39 = vrot.slane %v126_v37, %v104_v45  ;;  %v135_v40 = vrot.slane %v126_v37, %v2285_v9  ;;  %v143_v41 = vrot.slane %v126_v37, %v114_v46 }
 0x153   :  { %496 = vmatmul.mubr.f32.vlgmr.msra.gmra.mrb[0].mxu0 %v2345_v10  ;;  %961 = vmatmul.mubr.f32.vlgmr.msra.gmra.mrb[0].mxu1 %v2345_v10 }
 0x154   :  { %509 = vmatpush1.msra.mxu0 %v275_v1  ;;  %974 = vmatpush1.msra.mxu1 %v740_v2  ;;  %v150_v1 = vsub.s32 5, %v2275_v5  ;;  %v147_v2 = vrot.slane %v126_v37, %v146_v63 }
 0x155   :  { %572 = vmatprep.mubr.f32.mxu0 %v2218_v25  ;;  %581 = vmatprep.subr.mxu0 %v2295_v27  ;;  %v1205_v27 = vand.u32 4294901760, %v1204_v26 }
 0x156   :  { %1037 = vmatprep.mubr.f32.mxu1 %v2218_v25  ;;  %1046 = vmatprep.subr.mxu1 %v2301_v31  ;;  %v1200_v31 = vsub.f32 %v1198_v24, %v1199_v30 }
 0x157   :  { %v1206_v34 = vsub.f32 %v1204_v26, %v1205_v27 }
 0x158   :  { %v1201_v36 = vand.u32 4294901760, %v1200_v31 }
 0x15b   :  { %574 = vmatmul.mubr.f32.vlgmr.msra.gmra.mrb[0].mxu0 %v2339_v3  ;;  %1039 = vmatmul.mubr.f32.vlgmr.msra.gmra.mrb[0].mxu1 %v2339_v3 }
 0x15c   :  { %583 = vmatpush1.msra.mxu0 %v2297_v28  ;;  %1048 = vmatpush1.msra.mxu1 %v2303_v32  ;;  %v1207_v28 = vand.u32 4294901760, %v1206_v34  ;;  %v1665_v32 = vand.u32 4294901760, %v1664_v35 }
 0x15d   :  { %646 = vmatprep.mubr.f32.mxu0 %v2218_v25  ;;  %1111 = vmatprep.mubr.f32.mxu1 %v2218_v25 }
 0x15e   :  { %1120 = vmatprep.subr.mxu0 %v2374_v19  ;;  %2085 = vmatprep.subr.mxu1 %v2218_v25 }
 0x163   :  { %648 = vmatmul.mubr.f32.vlgmr.msra.gmra.mrb[0].mxu0 %v2339_v3  ;;  %1113 = vmatmul.mubr.f32.vlgmr.msra.gmra.mrb[0].mxu1 %v2339_v3 }
 0x164   :  { %1122 = vmatpush1.msra.mxu0 %v2380_v22  ;;  %2086 = vmatpush3.msra.mxu1 %v2382_v23 }
 0x165   :  { %1185 = vmatprep.mubr.f32.mxu0 %v2218_v25  ;;  %1202 = vmatprep.subr.mxu0 %v1201_v36 }
 0x166   :  { %2087 = vmatprep.mubr.msk.f32.mxu1 %vm2219_vm2, %v2218_v25  ;;  %2090 = vmatprep.subr.mxu1 %v2218_v25 }
 0x167   :  { %1191 = vmatmul.mubr.f32.vlgmr.msra.gmra.mrb[2].mxu0 %v2349_v14  ;;  %2088 = vmatmul.mubr.f32.vlgmr.msra.gmra.mrb[2].mxu1 %v2349_v14 }
 0x168   :  { %1208 = vmatpush1.msra.mxu0 %v1207_v28  ;;  %2091 = vmatpush3.msra.mxu1 %v1665_v32 }
 0x169   :  { %1271 = vmatprep.mubr.f32.mxu0 %v2218_v25  ;;  %1281 = vmatprep.subr.mxu0 %v1198_v24 }
 0x16a   :  { %2092 = vmatprep.mubr.msk.f32.mxu1 %vm2219_vm2, %v2218_v25  ;;  %2095 = vmatprep.subr.mxu1 %v2218_v25 }
 0x16f   :  { %1273 = vmatmul.mubr.f32.vlgmr.msra.gmra.mrb[2].mxu0 %v2339_v3  ;;  %2093 = vmatmul.mubr.f32.vlgmr.msra.gmra.mrb[2].mxu1 %v2339_v3 }
 0x170   :  { %1284 = vmatpush1.msra.mxu0 %v1204_v26  ;;  %2096 = vmatpush3.msra.mxu1 %v1662_v29 }
 0x171   :  { %1347 = vmatprep.mubr.f32.mxu0 %v2218_v25  ;;  %1357 = vmatprep.subr.mxu0 %v2374_v19 }
 0x172   :  { %2097 = vmatprep.mubr.msk.f32.mxu1 %vm2219_vm2, %v2218_v25  ;;  %2100 = vmatprep.subr.mxu1 %v2218_v25 }
 0x177   :  { %1350 = vmatmul.mubr.f32.vlgmr.msra.gmra.mrb[2].mxu0 %v2342_v4  ;;  %2098 = vmatmul.mubr.f32.vlgmr.msra.gmra.mrb[2].mxu1 %v2342_v4  ;;  %v151_v4 = vrot.slane %v126_v37, %v150_v1 }
 0x178   :  { %1359 = vmatpush1.msra.mxu0 %v2380_v22  ;;  %2101 = vmatpush3.msra.mxu1 %v2382_v23 }
 0x179   :  { %1422 = vmatprep.mubr.f32.mxu0 %v2218_v25  ;;  %1435 = vmatprep.subr.mxu0 %v1199_v30 }
 0x17a   :  { %2102 = vmatprep.mubr.msk.f32.mxu1 %vm2219_vm2, %v2218_v25  ;;  %2105 = vmatprep.subr.mxu1 %v2218_v25 }
 0x17f   :  { %1426 = vmatmul.mubr.f32.vlgmr.msra.gmra.mrb[2].mxu0 %v2345_v10  ;;  %2103 = vmatmul.mubr.f32.vlgmr.msra.gmra.mrb[2].mxu1 %v2345_v10 }
 0x180   :  { %1439 = vmatpush1.msra.mxu0 %v1205_v27  ;;  %2106 = vmatpush3.msra.mxu1 %v1663_v33 }
 0x181   :  { %1502 = vmatprep.mubr.f32.mxu0 %v2218_v25  ;;  %1511 = vmatprep.subr.mxu0 %v2374_v19 }
 0x182   :  { %2107 = vmatprep.mubr.msk.f32.mxu1 %vm2219_vm2, %v2218_v25  ;;  %2110 = vmatprep.subr.mxu1 %v2218_v25 }
 0x187   :  { %1504 = vmatmul.mubr.f32.vlgmr.msra.gmra.mrb[2].mxu0 %v2339_v3  ;;  %2108 = vmatmul.mubr.f32.vlgmr.msra.gmra.mrb[2].mxu1 %v2339_v3 }
 0x188   :  { %1513 = vmatpush1.msra.mxu0 %v2380_v22  ;;  %2111 = vmatpush3.msra.mxu1 %v2382_v23 }
 0x189   :  { %1576 = vmatprep.mubr.f32.mxu0 %v2218_v25  ;;  %2112 = vmatprep.mubr.msk.f32.mxu1 %vm2219_vm2, %v2218_v25 }
 0x18f   :  { %1578 = vmatmul.mubr.f32.vlgmr.msra.gmra.mrb[2].mxu0 %v2339_v3  ;;  %2113 = vmatmul.mubr.f32.vlgmr.msra.gmra.mrb[2].mxu1 %v2339_v3  ;;  %v155_v3 = vrot.slane %v126_v37, %v154_v0 }
 0x236   :  { %v649_v42 = vpop.f32.mrb[0].mxu0  ;;  %v1114_v25 = vpop.f32.mrb[0].mxu1 }
 0x237   :  { %v2115_v43 = vadd.f32 %v649_v42, %v131_v38  ;;  %v2117_v44 = vadd.f32 %v1114_v25, %v139_v39  ;;  %v651_v47 = vpop.f32.mrb[1].mxu0  ;;  %v1116_v48 = vpop.f32.mrb[1].mxu1 }
 0x238   :  { %v2116_v49 = vadd.f32 %v651_v47, %v135_v40  ;;  %v2118_v50 = vadd.f32 %v1116_v48, %v143_v41 }
 0x239   :  { %v2030_v51 = vmul.f32 0.5, %v2115_v43  ;;  %v2032_v52 = vmul.f32 0.5, %v2117_v44 }
 0x23a   :  { %v2031_v53 = vmul.f32 0.5, %v2116_v49  ;;  %v2033_v6 = vmul.f32 0.5, %v2118_v50 }
 0x23b   :  { %2175 = vtanh.f32 %v2030_v51 }
 0x23c   :  { %2177 = vtanh.f32 %v2032_v52 }
 0x23d   :  { %2179 = vtanh.f32 %v2031_v53 }
 0x23e   :  { %2181 = vtanh.f32 %v2033_v6 }
 0x245   :  { %v2176_v9 = vpop.eup %2175 }
 0x246   :  { %v2178_v45 = vpop.eup %2177  ;;  %v2044_v54 = vmul.f32 0.5, %v2176_v9 }
 0x247   :  { %v2180_v46 = vpop.eup %2179  ;;  %v2046_v55 = vmul.f32 0.5, %v2178_v45 }
 0x248   :  { %v2182_v56 = vpop.eup %2181  ;;  %v2051_v57 = vadd.f32 0.5, %v2044_v54  ;;  %v2045_v58 = vmul.f32 0.5, %v2180_v46 }
 0x249   :  { %v2053_v59 = vadd.f32 0.5, %v2046_v55  ;;  %v2047_v60 = vmul.f32 0.5, %v2182_v56 }
 0x24a   :  { %2058 = vst [vmem:[%s2484_s7] sm:$0xff] %v2051_v57  ;;  %v2052_v61 = vadd.f32 0.5, %v2045_v58 }
 0x24b   :  { %2060 = vst [vmem:[%s2484_s7 + $0x10] sm:$0xff] %v2053_v59  ;;  %v2054_v62 = vadd.f32 0.5, %v2047_v60 }
 0x24c   :  { %2059 = vst [vmem:[%s2484_s7 + $0x8] sm:$0xff] %v2052_v61 }
 0x24d   :  { %2061 = vst [vmem:[%s2484_s7 + $0x18] sm:$0xff] %v2054_v62 }
 0x262   :  { %v1579_v7 = vpop.f32.mrb[2].mxu0  ;;  %v2026_v8 = vpop.f32.mrb[2].mxu1 }
 0x263   :  { %v2119_v10 = vadd.f32 %v1579_v7, %v147_v2  ;;  %v2121_v11 = vadd.f32 %v2026_v8, %v155_v3  ;;  %v1581_v12 = vpop.f32.mrb[3].mxu0  ;;  %v2114_v13 = vpop.f32.mrb[3].mxu1 }
 0x264   :  { %v2120_v14 = vadd.f32 %v1581_v12, %v151_v4 }
 0x265   :  { %v2034_v15 = vmul.f32 0.5, %v2119_v10  ;;  %v2036_v16 = vmul.f32 0.5, %v2121_v11 }
 0x266   :  { %v2035_v17 = vmul.f32 0.5, %v2120_v14 }
 0x267   :  { %2183 = vtanh.f32 %v2034_v15 }
 0x268   :  { %2185 = vtanh.f32 %v2036_v16 }
 0x269   :  { %2187 = vtanh.f32 %v2035_v17 }
 0x271   :  { %v2184_v18 = vpop.eup %2183 }
 0x272   :  { %v2186_v19 = vpop.eup %2185  ;;  %v2048_v20 = vmul.f32 0.5, %v2184_v18 }
 0x273   :  { %v2188_v5 = vpop.eup %2187  ;;  %v2050_v21 = vmul.f32 0.5, %v2186_v19 }
 0x274   :  { %v2055_v22 = vadd.f32 0.5, %v2048_v20  ;;  %v2049_v23 = vmul.f32 0.5, %v2188_v5 }
 0x275   :  { %v2057_v24 = vadd.f32 0.5, %v2050_v21 }
 0x276   :  { %2062 = vst [vmem:[%s2484_s7 + $0x20] sm:$0xff] %v2055_v22  ;;  %v2056_v26 = vadd.f32 0.5, %v2049_v23 }
 0x277   :  { %2065 = vst.msk [vmem:[%s2484_s7 + $0x30] sm:$0xff] %vm2064_vm3, %v2057_v24 }
 0x278   :  { %2063 = vst [vmem:[%s2484_s7 + $0x28] sm:$0xff] %v2056_v26 }
 0x279   :  { %2070 = vsyncpa [#allocation3], 1 }

</bundles_post_ra>
